<compile_context>
chip_gen: v7x
topology: tpu7x:2x2x1
jax: 0.10.0
libtpu: 0.0.40
codegen_flags: <defaults>
</compile_context>

<pallas_src>
import numpy as np
import jax
import jax.numpy as jnp
from jax.experimental import pallas as pl
from jax.experimental.pallas import tpu as pltpu

SAMPLE_RATE = 8000
N_MELS = 81
WIN_LENGTH = 160
HOP = 80                        # hop_length
N_FFT = 400                     # torchaudio default n_fft
N_FREQS = N_FFT // 2 + 1        # 201 (onesided)
N_CHUNKS = N_FFT // HOP         # 5 hop rows per analysis window

CHUNK_W = 128                   # lane-aligned width of one 80-sample chunk
N_FFT_PAD = N_CHUNKS * CHUNK_W  # 640: fused-K DFT contraction size
FREQ_PAD = 256                  # 201 -> 256 (lane aligned)
RI_PAD = 2 * FREQ_PAD           # fused [cos | sin] weight width = 512
MEL_PAD = 128                   # 81 -> 128 (lane-dense output, unmasked stores)

MAX_TILE_FRAMES = 1024          # frames per grid step


def _round_up(x, m):
    return ((x + m - 1) // m) * m


def _cdiv(a, b):
    return -(-a // b)


# ---------------- deterministic "parameters" (DFT + mel filterbank) ----------

def _fused_dft_weights():
    """(640, 512) fused [cos | sin] windowed DFT basis, chunk-padded rows."""
    # periodic hann window of win_length, centered inside n_fft (torch.stft)
    n = np.arange(WIN_LENGTH)
    win = 0.5 - 0.5 * np.cos(2.0 * np.pi * n / WIN_LENGTH)
    window = np.zeros(N_FFT)
    left = (N_FFT - WIN_LENGTH) // 2
    window[left:left + WIN_LENGTH] = win

    k = np.arange(N_FREQS)[:, None]
    nn = np.arange(N_FFT)[None, :]
    ang = 2.0 * np.pi * k * nn / N_FFT
    cos_w = (np.cos(ang) * window[None, :]).T        # (n_fft, n_freqs)
    sin_w = (np.sin(ang) * window[None, :]).T        # sign irrelevant (power)

    # Chunk j (80 samples) occupies rows [j*128, j*128+80); pad rows are zero
    # so the 48 unused lanes of each assembled frame chunk contribute nothing.
    w = np.zeros((N_FFT_PAD, RI_PAD), dtype=np.float32)
    for j in range(N_CHUNKS):
        dst = slice(j * CHUNK_W, j * CHUNK_W + HOP)
        src = slice(j * HOP, (j + 1) * HOP)
        w[dst, :N_FREQS] = cos_w[src]
        w[dst, FREQ_PAD:FREQ_PAD + N_FREQS] = sin_w[src]
    return w


def _mel_weights():
    """(256, 128) HTK mel filterbank (norm=None), zero-padded rows/cols."""
    f_min, f_max = 0.0, SAMPLE_RATE / 2.0
    all_freqs = np.linspace(0.0, SAMPLE_RATE / 2.0, N_FREQS)

    def hz_to_mel(f):
        return 2595.0 * np.log10(1.0 + f / 700.0)

    def mel_to_hz(m):
        return 700.0 * (10.0 ** (m / 2595.0) - 1.0)

    m_pts = np.linspace(hz_to_mel(f_min), hz_to_mel(f_max), N_MELS + 2)
    f_pts = mel_to_hz(m_pts)
    f_diff = f_pts[1:] - f_pts[:-1]
    slopes = f_pts[None, :] - all_freqs[:, None]      # (n_freqs, n_mels+2)
    down = -slopes[:, :-2] / f_diff[:-1]
    up = slopes[:, 2:] / f_diff[1:]
    fb = np.maximum(0.0, np.minimum(down, up))        # (n_freqs, n_mels)

    fb_pad = np.zeros((FREQ_PAD, MEL_PAD), dtype=np.float32)
    fb_pad[:N_FREQS, :N_MELS] = fb                    # zero rows/cols are no-ops
    return fb_pad


# ---------------- Pallas kernel ----------------------------------------------

def _make_kernel(tile_frames):
    tm = tile_frames

    def kernel(h0_ref, h1_ref, w_ref, fb_ref, out_ref,
               hop_scratch, frame_scratch, dft_scratch, pow_scratch):
        # 1) Stitch hop blocks i and i+1 -> contiguous (2*tm, 80) f32 buffer.
        hop_scratch[0:tm, :] = h0_ref[...]
        hop_scratch[tm:, :] = h1_ref[...]
        hops = hop_scratch[...]                              # (2*tm, HOP)

        # 2) Assemble the overlapped frames on-chip in a lane-aligned bf16
        #    layout: chunk j lives in lanes [j*128, j*128+80) and holds hop
        #    rows [j, j+tm) (frame r = hops[r : r+5]).  The scratch is zeroed
        #    first so the 48 pad lanes per chunk hold finite zeros (they meet
        #    zero weight rows in the DFT matrix).
        frame_scratch[...] = jnp.zeros_like(frame_scratch)
        for j in range(N_CHUNKS):
            shifted = hops if j == 0 else pltpu.roll(hops, 2 * tm - j, axis=0)
            frame_scratch[:, j * CHUNK_W:j * CHUNK_W + HOP] = (
                shifted[0:tm, :].astype(jnp.bfloat16))

        # 3) Single fused windowed real-DFT matmul (bf16 x bf16 -> f32 acc).
        dft_scratch[...] = jnp.dot(frame_scratch[...], w_ref[...],
                                   preferred_element_type=jnp.float32)
        re = dft_scratch[:, 0:FREQ_PAD]                      # (tm, 256)
        im = dft_scratch[:, FREQ_PAD:]
        pow_scratch[...] = (re * re + im * im).astype(jnp.bfloat16)

        # 4) Mel projection + log.
        mel = jnp.dot(pow_scratch[...], fb_ref[...],
                      preferred_element_type=jnp.float32)    # (tm, 128)
        out_ref[...] = jnp.log(mel + 1e-9)

    return kernel


def log_mel_spectrogram(waveform):
    """waveform: (B, time) -> (B, n_mels, n_frames) float32."""
    waveform = jnp.asarray(waveform, jnp.float32)
    B, time = waveform.shape
    pad = N_FFT // 2                                  # 200, center=True
    assert time > pad, "reflect padding requires time > n_fft // 2"
    n_frames = 1 + time // HOP

    # Tile size: multiple of 8; when B == 1 split frames into >= 2 tiles so
    # both v7x TensorCores get work ("parallel" grid axes).
    if B >= 2:
        tm = _round_up(n_frames, 8)
    else:
        tm = _round_up(_cdiv(n_frames, 2), 8)
    tm = max(8, min(MAX_TILE_FRAMES, tm))

    n_tiles = _cdiv(n_frames, tm)
    n_frames_pad = n_tiles * tm
    n_hops = (n_tiles + 1) * tm                       # +1 lookahead hop block

    padded = jnp.pad(waveform, ((0, 0), (pad, pad)), mode="reflect")
    extra = n_hops * HOP - padded.shape[1]
    assert extra >= 0
    padded = jnp.pad(padded, ((0, 0), (0, extra)))
    hops = padded.reshape(B, n_hops, HOP)             # (B, n_hops, 80) f32

    w = jnp.asarray(_fused_dft_weights(), jnp.bfloat16)   # (640, 512)
    fb = jnp.asarray(_mel_weights(), jnp.bfloat16)        # (256, 128)

    flops = 2 * B * n_frames_pad * (N_FFT_PAD * RI_PAD + FREQ_PAD * MEL_PAD)
    bytes_accessed = (2 * B * n_tiles * tm * HOP * 4            # hop blocks
                      + B * n_frames_pad * MEL_PAD * 4          # output
                      + (N_FFT_PAD * RI_PAD + FREQ_PAD * MEL_PAD) * 2)  # weights

    out = pl.pallas_call(
        _make_kernel(tm),
        out_shape=jax.ShapeDtypeStruct((B, n_frames_pad, MEL_PAD), jnp.float32),
        grid_spec=pltpu.PrefetchScalarGridSpec(
            num_scalar_prefetch=0,
            grid=(B, n_tiles),
            in_specs=[
                pl.BlockSpec((None, tm, HOP), lambda b, i: (b, i, 0)),
                pl.BlockSpec((None, tm, HOP), lambda b, i: (b, i + 1, 0)),
                pl.BlockSpec((N_FFT_PAD, RI_PAD), lambda b, i: (0, 0)),
                pl.BlockSpec((FREQ_PAD, MEL_PAD), lambda b, i: (0, 0)),
            ],
            out_specs=pl.BlockSpec((None, tm, MEL_PAD), lambda b, i: (b, i, 0)),
            scratch_shapes=[
                pltpu.VMEM((2 * tm, HOP), jnp.float32),     # stitched hops
                pltpu.VMEM((tm, N_FFT_PAD), jnp.bfloat16),  # assembled frames
                pltpu.VMEM((tm, RI_PAD), jnp.float32),      # DFT (re|im)
                pltpu.VMEM((tm, FREQ_PAD), jnp.bfloat16),   # power spectrum
            ],
        ),
        compiler_params=pltpu.CompilerParams(
            dimension_semantics=("parallel", "parallel"),
            vmem_limit_bytes=48 * 1024 * 1024),
        cost_estimate=pl.CostEstimate(
            flops=int(flops),
            transcendentals=int(B * n_frames_pad * MEL_PAD),
            bytes_accessed=int(bytes_accessed)),
    )(hops, hops, w, fb)

    out = out[:, :n_frames, :N_MELS]                  # drop pad rows/mel cols
    return jnp.transpose(out, (0, 2, 1))              # (B, n_mels, T)


if __name__ == "__main__":
    key = jax.random.PRNGKey(0)
    # small input: batch=2, 640 samples (= 80 ms at 8 kHz) -> 9 frames
    wav = jax.random.normal(key, (2, 640), dtype=jnp.float32)
    fn = jax.jit(log_mel_spectrogram)
    out = fn(wav)
    jax.block_until_ready(out)
    assert out.shape == (2, N_MELS, 1 + 640 // HOP), out.shape
    assert out.dtype == jnp.float32
    assert bool(jnp.all(jnp.isfinite(out)))
    print("KERNEL_OK")
</pallas_src>

<mosaic_0001>
module attributes {stable_mosaic.version = 11 : i64} {
  func.func @kernel(%arg0: i32, %arg1: i32, %arg2: memref<1x16x80xf32, #tpu.memory_space<vmem>>, %arg3: memref<1x16x80xf32, #tpu.memory_space<vmem>>, %arg4: memref<640x512xbf16, #tpu.memory_space<vmem>>, %arg5: memref<256x128xbf16, #tpu.memory_space<vmem>>, %arg6: memref<1x16x128xf32, #tpu.memory_space<vmem>>, %arg7: memref<32x80xf32, #tpu.memory_space<vmem>>, %arg8: memref<16x640xbf16, #tpu.memory_space<vmem>>, %arg9: memref<16x512xf32, #tpu.memory_space<vmem>>, %arg10: memref<16x256xbf16, #tpu.memory_space<vmem>>) attributes {dimension_semantics = [#tpu.dimension_semantics<parallel>, #tpu.dimension_semantics<parallel>], iteration_bounds = array<i64: 2, 1>, scalar_prefetch = 0 : i64, scratch_operands = 4 : i64, tpu.core_type = #tpu.core_type<tc>, window_params = [{transform_indices = @transform_0, window_bounds = array<i64: 1, 16, 80>}, {transform_indices = @transform_1, window_bounds = array<i64: 1, 16, 80>}, {pipeline_mode = #tpu.pipeline_mode<synchronous>, transform_indices = @transform_2, window_bounds = array<i64: 640, 512>}, {pipeline_mode = #tpu.pipeline_mode<synchronous>, transform_indices = @transform_3, window_bounds = array<i64: 256, 128>}, {transform_indices = @transform_4, window_bounds = array<i64: 1, 16, 128>}]} {
    %c0 = arith.constant 0 : index
    %c0_0 = arith.constant 0 : index
    %c0_1 = arith.constant 0 : index
    %0 = vector.load %arg2[%c0, %c0_0, %c0_1] : memref<1x16x80xf32, #tpu.memory_space<vmem>>, vector<1x16x80xf32>
    %1 = vector.shape_cast %0 : vector<1x16x80xf32> to vector<16x80xf32>
    %c0_2 = arith.constant 0 : index
    %c0_3 = arith.constant 0 : index
    %2 = vector.load %arg7[%c0_2, %c0_3] : memref<32x80xf32, #tpu.memory_space<vmem>>, vector<16x80xf32>
    tpu.vector_store %arg7[%c0_2, %c0_3], %1 {strides = array<i32>} : memref<32x80xf32, #tpu.memory_space<vmem>>, vector<16x80xf32>,
    %c0_4 = arith.constant 0 : index
    %c0_5 = arith.constant 0 : index
    %c0_6 = arith.constant 0 : index
    %3 = vector.load %arg3[%c0_4, %c0_5, %c0_6] : memref<1x16x80xf32, #tpu.memory_space<vmem>>, vector<1x16x80xf32>
    %4 = vector.shape_cast %3 : vector<1x16x80xf32> to vector<16x80xf32>
    %c16 = arith.constant 16 : index
    %c0_7 = arith.constant 0 : index
    %5 = vector.load %arg7[%c16, %c0_7] : memref<32x80xf32, #tpu.memory_space<vmem>>, vector<16x80xf32>
    tpu.vector_store %arg7[%c16, %c0_7], %4 {strides = array<i32>} : memref<32x80xf32, #tpu.memory_space<vmem>>, vector<16x80xf32>,
    %c0_8 = arith.constant 0 : index
    %c0_9 = arith.constant 0 : index
    %6 = vector.load %arg7[%c0_8, %c0_9] : memref<32x80xf32, #tpu.memory_space<vmem>>, vector<32x80xf32>
    %cst = arith.constant 0.000000e+00 : bf16
    %7 = vector.broadcast %cst : bf16 to vector<16x640xbf16>
    %c0_10 = arith.constant 0 : index
    %c0_11 = arith.constant 0 : index
    %8 = vector.load %arg8[%c0_10, %c0_11] : memref<16x640xbf16, #tpu.memory_space<vmem>>, vector<16x640xbf16>
    tpu.vector_store %arg8[%c0_10, %c0_11], %7 {strides = array<i32>} : memref<16x640xbf16, #tpu.memory_space<vmem>>, vector<16x640xbf16>,
    %9 = vector.extract_strided_slice %6 {offsets = [0, 0], sizes = [16, 80], strides = [1, 1]} : vector<32x80xf32> to vector<16x80xf32>
    %10 = arith.truncf %9 : vector<16x80xf32> to vector<16x80xbf16>
    %c0_12 = arith.constant 0 : index
    %c0_13 = arith.constant 0 : index
    %11 = vector.load %arg8[%c0_12, %c0_13] : memref<16x640xbf16, #tpu.memory_space<vmem>>, vector<16x80xbf16>
    tpu.vector_store %arg8[%c0_12, %c0_13], %10 {strides = array<i32>} : memref<16x640xbf16, #tpu.memory_space<vmem>>, vector<16x80xbf16>,
    %c31_i32 = arith.constant 31 : i32
    %12 = tpu.dynamic_rotate %6 by %c31_i32 dim 0 : vector<32x80xf32>, i32 -> vector<32x80xf32>
    %13 = vector.extract_strided_slice %12 {offsets = [0, 0], sizes = [16, 80], strides = [1, 1]} : vector<32x80xf32> to vector<16x80xf32>
    %14 = arith.truncf %13 : vector<16x80xf32> to vector<16x80xbf16>
    %c0_14 = arith.constant 0 : index
    %c128 = arith.constant 128 : index
    %15 = vector.load %arg8[%c0_14, %c128] : memref<16x640xbf16, #tpu.memory_space<vmem>>, vector<16x80xbf16>
    tpu.vector_store %arg8[%c0_14, %c128], %14 {strides = array<i32>} : memref<16x640xbf16, #tpu.memory_space<vmem>>, vector<16x80xbf16>,
    %c30_i32 = arith.constant 30 : i32
    %16 = tpu.dynamic_rotate %6 by %c30_i32 dim 0 : vector<32x80xf32>, i32 -> vector<32x80xf32>
    %17 = vector.extract_strided_slice %16 {offsets = [0, 0], sizes = [16, 80], strides = [1, 1]} : vector<32x80xf32> to vector<16x80xf32>
    %18 = arith.truncf %17 : vector<16x80xf32> to vector<16x80xbf16>
    %c0_15 = arith.constant 0 : index
    %c256 = arith.constant 256 : index
    %19 = vector.load %arg8[%c0_15, %c256] : memref<16x640xbf16, #tpu.memory_space<vmem>>, vector<16x80xbf16>
    tpu.vector_store %arg8[%c0_15, %c256], %18 {strides = array<i32>} : memref<16x640xbf16, #tpu.memory_space<vmem>>, vector<16x80xbf16>,
    %c29_i32 = arith.constant 29 : i32
    %20 = tpu.dynamic_rotate %6 by %c29_i32 dim 0 : vector<32x80xf32>, i32 -> vector<32x80xf32>
    %21 = vector.extract_strided_slice %20 {offsets = [0, 0], sizes = [16, 80], strides = [1, 1]} : vector<32x80xf32> to vector<16x80xf32>
    %22 = arith.truncf %21 : vector<16x80xf32> to vector<16x80xbf16>
    %c0_16 = arith.constant 0 : index
    %c384 = arith.constant 384 : index
    %23 = vector.load %arg8[%c0_16, %c384] : memref<16x640xbf16, #tpu.memory_space<vmem>>, vector<16x80xbf16>
    tpu.vector_store %arg8[%c0_16, %c384], %22 {strides = array<i32>} : memref<16x640xbf16, #tpu.memory_space<vmem>>, vector<16x80xbf16>,
    %c28_i32 = arith.constant 28 : i32
    %24 = tpu.dynamic_rotate %6 by %c28_i32 dim 0 : vector<32x80xf32>, i32 -> vector<32x80xf32>
    %25 = vector.extract_strided_slice %24 {offsets = [0, 0], sizes = [16, 80], strides = [1, 1]} : vector<32x80xf32> to vector<16x80xf32>
    %26 = arith.truncf %25 : vector<16x80xf32> to vector<16x80xbf16>
    %c0_17 = arith.constant 0 : index
    %c512 = arith.constant 512 : index
    %27 = vector.load %arg8[%c0_17, %c512] : memref<16x640xbf16, #tpu.memory_space<vmem>>, vector<16x80xbf16>
    tpu.vector_store %arg8[%c0_17, %c512], %26 {strides = array<i32>} : memref<16x640xbf16, #tpu.memory_space<vmem>>, vector<16x80xbf16>,
    %c0_18 = arith.constant 0 : index
    %c0_19 = arith.constant 0 : index
    %28 = vector.load %arg8[%c0_18, %c0_19] : memref<16x640xbf16, #tpu.memory_space<vmem>>, vector<16x640xbf16>
    %c0_20 = arith.constant 0 : index
    %c0_21 = arith.constant 0 : index
    %29 = vector.load %arg4[%c0_20, %c0_21] : memref<640x512xbf16, #tpu.memory_space<vmem>>, vector<640x512xbf16>
    %cst_22 = arith.constant dense<0.000000e+00> : vector<16x512xf32>
    %30 = tpu.matmul %28, %29, %cst_22 {dimension_numbers = #tpu.dot_dimension_numbers<[1], [0], [0], [1], [0, 0, 1, 1], [], []>} : vector<16x640xbf16>, vector<640x512xbf16>, vector<16x512xf32> -> vector<16x512xf32>
    %c0_23 = arith.constant 0 : index
    %c0_24 = arith.constant 0 : index
    %31 = vector.load %arg9[%c0_23, %c0_24] : memref<16x512xf32, #tpu.memory_space<vmem>>, vector<16x512xf32>
    tpu.vector_store %arg9[%c0_23, %c0_24], %30 {strides = array<i32>} : memref<16x512xf32, #tpu.memory_space<vmem>>, vector<16x512xf32>,
    %c0_25 = arith.constant 0 : index
    %c0_26 = arith.constant 0 : index
    %32 = vector.load %arg9[%c0_25, %c0_26] : memref<16x512xf32, #tpu.memory_space<vmem>>, vector<16x256xf32>
    %c0_27 = arith.constant 0 : index
    %c256_28 = arith.constant 256 : index
    %33 = vector.load %arg9[%c0_27, %c256_28] : memref<16x512xf32, #tpu.memory_space<vmem>>, vector<16x256xf32>
    %34 = arith.mulf %32, %32 : vector<16x256xf32>
    %35 = arith.mulf %33, %33 : vector<16x256xf32>
    %36 = arith.addf %34, %35 : vector<16x256xf32>
    %37 = arith.truncf %36 : vector<16x256xf32> to vector<16x256xbf16>
    %c0_29 = arith.constant 0 : index
    %c0_30 = arith.constant 0 : index
    %38 = vector.load %arg10[%c0_29, %c0_30] : memref<16x256xbf16, #tpu.memory_space<vmem>>, vector<16x256xbf16>
    tpu.vector_store %arg10[%c0_29, %c0_30], %37 {strides = array<i32>} : memref<16x256xbf16, #tpu.memory_space<vmem>>, vector<16x256xbf16>,
    %c0_31 = arith.constant 0 : index
    %c0_32 = arith.constant 0 : index
    %39 = vector.load %arg10[%c0_31, %c0_32] : memref<16x256xbf16, #tpu.memory_space<vmem>>, vector<16x256xbf16>
    %c0_33 = arith.constant 0 : index
    %c0_34 = arith.constant 0 : index
    %40 = vector.load %arg5[%c0_33, %c0_34] : memref<256x128xbf16, #tpu.memory_space<vmem>>, vector<256x128xbf16>
    %cst_35 = arith.constant dense<0.000000e+00> : vector<16x128xf32>
    %41 = tpu.matmul %39, %40, %cst_35 {dimension_numbers = #tpu.dot_dimension_numbers<[1], [0], [0], [1], [0, 0, 1, 1], [], []>} : vector<16x256xbf16>, vector<256x128xbf16>, vector<16x128xf32> -> vector<16x128xf32>
    %cst_36 = arith.constant 9.99999971E-10 : f32
    %42 = vector.broadcast %cst_36 : f32 to vector<16x128xf32>
    %43 = arith.addf %41, %42 : vector<16x128xf32>
    %44 = math.log %43 : vector<16x128xf32>
    %c0_37 = arith.constant 0 : index
    %c0_38 = arith.constant 0 : index
    %c0_39 = arith.constant 0 : index
    %45 = vector.load %arg6[%c0_37, %c0_38, %c0_39] : memref<1x16x128xf32, #tpu.memory_space<vmem>>, vector<1x16x128xf32>
    %46 = vector.shape_cast %45 : vector<1x16x128xf32> to vector<16x128xf32>
    %47 = vector.shape_cast %44 : vector<16x128xf32> to vector<1x16x128xf32>
    tpu.vector_store %arg6[%c0_37, %c0_38, %c0_39], %47 {strides = array<i32>} : memref<1x16x128xf32, #tpu.memory_space<vmem>>, vector<1x16x128xf32>,
    return
  }
  func.func @transform_0(%arg0: i32, %arg1: i32) -> (i32, i32, i32) {
    %c0_i32 = arith.constant 0 : i32
    %c0_i32_0 = arith.constant 0 : i32
    return %arg0, %arg1, %c0_i32 : i32, i32, i32
  }
  func.func @transform_1(%arg0: i32, %arg1: i32) -> (i32, i32, i32) {
    %c1_i32 = arith.constant 1 : i32
    %0 = arith.addi %arg1, %c1_i32 : i32
    %c0_i32 = arith.constant 0 : i32
    %c0_i32_0 = arith.constant 0 : i32
    return %arg0, %0, %c0_i32 : i32, i32, i32
  }
  func.func @transform_2(%arg0: i32, %arg1: i32) -> (i32, i32) {
    %c0_i32 = arith.constant 0 : i32
    %c0_i32_0 = arith.constant 0 : i32
    %c0_i32_1 = arith.constant 0 : i32
    return %c0_i32, %c0_i32_0 : i32, i32
  }
  func.func @transform_3(%arg0: i32, %arg1: i32) -> (i32, i32) {
    %c0_i32 = arith.constant 0 : i32
    %c0_i32_0 = arith.constant 0 : i32
    %c0_i32_1 = arith.constant 0 : i32
    return %c0_i32, %c0_i32_0 : i32, i32
  }
  func.func @transform_4(%arg0: i32, %arg1: i32) -> (i32, i32, i32) {
    %c0_i32 = arith.constant 0 : i32
    %c0_i32_0 = arith.constant 0 : i32
    return %arg0, %arg1, %c0_i32 : i32, i32, i32
  }
}

</mosaic_0001>

<bundles_post_ra>
// kernel: reverse.1
= control target key start
LH: loop header
LB: loop body
LE: loop exit
PB: predicated region body
PF: predicated region fallthrough
CT: control target
= control target key end

     0   :  { %v2_v0 = vlaneseq  ;;  %s311_s0 = inlined_call_operand.vmem [shape: f32[2,256], index: 0, kind: input, shape index: {}]   ;;  %s312_s1 = inlined_call_operand.vmem [shape: f32[2,256], index: 1, kind: output, shape index: {}]  }
   0x2   :  { %v3_v1 = vsub.s32 127, %v2_v0 }
   0x4   :  { %4 = vset.pattern.permute.xlu0 %v3_v1 }
   0x5   :  { %s271_s6 = smov 0   ;;  %s273_s7 = smov 0  }
   0x6   :  { %s275_s8 = smov 0  }
   0x7 LB: > { %s201_s9 = sadd.s32 4294967295, %s259_s8   ;;  %s19_s10 = sadd.s32 1, %s255_s7  ;;  %s259_s8 = sphi %s275_s8, %s10_s8   ;;  %s255_s7 = sphi %s273_s7, %s314_s7   ;;  %s251_s6 = sphi %s271_s6, %s313_s6  }
   0x8   : > { %p20_p0 = scmp.ge.s32.totalorder %s19_s10, 2  ;;  %p203_p1 = scmp.ge.s32.totalorder %s259_s8, 2 }
   0x9   : > { %s38_s11 = sand.u32 (!%p203_p1), 1, %s259_s8   ;;  %s41_s12 = ssub.s32 (!%p203_p1), 1, %s255_s7 }
   0xa   : > { %s316_s10 = smov (%p20_p0, %s19_s10), 0  ;;  %36 = sbr.rel (%p203_p1) target bundleno = 17 (0x11), region = 16 }
   0xb   : > { %s204_s13 = sshll.u32 (!%p203_p1), %s38_s11, 1  ;;  %s205_s14 = sshll.u32 (!%p203_p1), %s41_s12, 1 }
   0xc   : > { %s45_s17 = scalar_lea.vmem (!%p203_p1), %s311_s0, %s205_s14  ;;  %s40_s18 = scalar_lea.vmem (!%p203_p1), [#allocation1], %s204_s13 }
   0xd   : > { %v61_v2 = vld [vmem:[%s45_s17] sm:$0x3] (!%p203_p1) }
   0xe   : > { %62 = vst [vmem:[%s40_s18] sm:$0x3] (!%p203_p1), %v61_v2 }
  0x11 PF: > { %p206_p2 = scmp.ge.s32.totalorder %s259_s8, 1  ;;  %p78_p3 = scmp.lt.s32.totalorder %s259_s8, 3 }
  0x13   : > { %p79_p4 = pnand %p206_p2, %p78_p3 }
  0x14   : > { %s89_s19 = sand.u32 (!%p79_p4), 1, %s201_s9   ;;  %s210_s23 = sshll.u32 (!%p79_p4), %s251_s6, 1 }
  0x15   : > { %82 = sbr.rel (%p79_p4) target bundleno = 177 (0xb1), region = 50  ;;  %s207_s20 = sshll.u32 (!%p79_p4), %s89_s19, 1 }
  0x16   : > { %s91_s21 = scalar_lea.vmem (!%p79_p4), [#allocation1], %s207_s20  ;;  %s95_s22 = scalar_lea.vmem (!%p79_p4), [#allocation3], %s207_s20 }
  0x17   : > { %v98_v3 = vld [vmem:[%s91_s21] sm:$0x3] (!%p79_p4)  ;;  %s118_s26 = scalar_lea.vmem (!%p79_p4), %s312_s1, %s210_s23 }
  0x18   : > { %99 = vst [vmem:[#allocation0] sm:$0x3] (!%p79_p4), %v98_v3 }
  0x1f   : > { %v101_v4 = vld [vmem:[#allocation0] sm:$0xff] }
  0x20   : > { %102 = vperm.xlu0 %4, %v101_v4  }
  0x9f   : > { %v103_v5 = vpop.permute.xlu0 %102 }
  0xa0   : > { %104 = vst [vmem:[#allocation2] sm:$0xff] %v103_v5 }
  0xa7   : > { %v108_v6 = vld [vmem:[#allocation2] sm:$0x3] }
  0xa8   : > { %110 = vst [vmem:[%s95_s22] sm:$0x3] %v108_v6 }
  0xaf   : > { %v134_v7 = vld [vmem:[%s95_s22] sm:$0x3] }
  0xb0   : > { %135 = vst [vmem:[%s118_s26] sm:$0x3] %v134_v7 }
  0xb1 PF: > { %s10_s8 = sadd.s32 1, %s259_s8   ;;  %s313_s6 = smov %s255_s7 }
  0xb2   : > { %p7_p5 = scmp.ge.s32.totalorder %s10_s8, 4   ;;  %s314_s7 = smov %s316_s10 }
  0xb4   :  { %9 = sbr.rel (!%p7_p5) target bundleno = 7 (0x7), region = 110 }

</bundles_post_ra>
